<compile_context>
chip_gen: v6e
topology: v6e:2x2x1
jax: 0.10.0
libtpu: 0.0.40
codegen_flags: <defaults>
</compile_context>

<pallas_src>
import functools

import jax
import jax.numpy as jnp
from jax.experimental import pallas as pl
from jax.experimental.pallas import tpu as pltpu


def _round_up(x: int, m: int) -> int:
    return (x + m - 1) // m * m


def _cdiv(a: int, b: int) -> int:
    return (a + b - 1) // b


@functools.lru_cache(maxsize=1)
def _vmem_capacity_bytes() -> int:
    """Physical VMEM per core; conservative 64 MiB fallback if unknown."""
    try:
        cap = getattr(pltpu.get_tpu_info(), "vmem_capacity_bytes", None)
        if cap:
            return int(cap)
    except Exception:
        pass
    return 64 * 2**20


def _hidden_tile(H: int, th_target: int):
    """Hidden tile: the 128-multiple <= th_target that pads H the least
    (ties broken toward the larger tile); H itself if it fits in one tile."""
    if H <= th_target:
        return H, H
    best = None
    for k in range(1, max(1, th_target // 128) + 1):
        th = 128 * k
        Hp = _cdiv(H, th) * th
        key = (Hp - H, -th)
        if best is None or key < best[0]:
            best = (key, th, Hp)
    return best[1], best[2]


# ---------------------------------------------------------------------------
# Kernel
# ---------------------------------------------------------------------------
def _swiglu_kernel(x_ref, w13_ref, w2_ref, o_ref, acc_ref, *, th):
    # x_ref:   (tm, D)        token tile (constant across the hidden axis)
    # w13_ref: (1, D, 2*th)   packed [W1 | W3] columns for this hidden tile
    # w2_ref:  (th, D)        rows of W2 for this hidden tile
    # acc_ref: (tm, D) f32    down-projection accumulator
    j = pl.program_id(1)

    @pl.when(j == 0)
    def _():
        acc_ref[...] = jnp.zeros_like(acc_ref)

    x = x_ref[...]
    w13 = w13_ref[0]                                            # (D, 2*th)

    # Fused up-projection on the MXU, f32 accumulation.
    h = jnp.dot(x, w13, preferred_element_type=jnp.float32)    # (tm, 2*th)
    h1 = h[:, :th]
    h3 = h[:, th:]

    # silu(h1) = h1 / (1 + exp(-h1)); exp + approx reciprocal -> EUP slot.
    # exp overflow to inf for very negative h1 gives reciprocal->0, gate->0,
    # which matches the silu asymptote (exercised by the extreme-input test).
    gate = h1 * pl.reciprocal(1.0 + jnp.exp(-h1), approx=True)
    g = (gate * h3).astype(w2_ref.dtype)

    acc_ref[...] += jnp.dot(g, w2_ref[...], preferred_element_type=jnp.float32)

    @pl.when(j == pl.num_programs(1) - 1)
    def _():
        o_ref[...] = acc_ref[...].astype(o_ref.dtype)


# ---------------------------------------------------------------------------
# One-time weight preparation (do NOT call per forward)
# ---------------------------------------------------------------------------
def pack_swiglu_weights(w1, w3, w2, *, th=None):
    """Pad the hidden dim to a tile multiple and pack [W1 | W3] per hidden
    tile into a (nh, D, 2*th) array plus a padded W2 (Hp, D).

    Call this ONCE at weight-load time and reuse the result with
    `swiglu_packed`; repacking per forward costs an extra weight-sized HBM
    round trip (the main loss flagged in review). Hidden zero-padding is
    mathematically inert for SwiGLU.
    """
    D, H = w1.shape
    assert w3.shape == (D, H) and w2.shape == (H, D)
    th_target = 512 if _vmem_capacity_bytes() >= 96 * 2**20 else 256
    if th is None:
        th, Hp = _hidden_tile(H, th_target)
    elif th >= H:
        th, Hp = H, H
    else:
        th = _round_up(th, 128)                        # (8,128) lane constraint
        Hp = _round_up(H, th)
    nh = Hp // th
    if Hp != H:
        w1 = jnp.pad(w1, ((0, 0), (0, Hp - H)))
        w3 = jnp.pad(w3, ((0, 0), (0, Hp - H)))
        w2 = jnp.pad(w2, ((0, Hp - H), (0, 0)))
    w13 = jnp.concatenate(
        [w1.reshape(D, nh, th).transpose(1, 0, 2),
         w3.reshape(D, nh, th).transpose(1, 0, 2)],
        axis=-1)                                       # (nh, D, 2*th)
    return w13, w2


# ---------------------------------------------------------------------------
# Forward with pre-packed weights (hot path)
# ---------------------------------------------------------------------------
@functools.partial(jax.jit, static_argnames=("tm",))
def swiglu_packed(x, w13, w2p, *, tm=None):
    """x: (..., D); w13: (nh, D, 2*th) from pack_swiglu_weights; w2p: (nh*th, D)."""
    orig_shape = x.shape
    D = orig_shape[-1]
    nh, Dw, th2 = w13.shape
    th = th2 // 2
    Hp = nh * th
    assert Dw == D and w2p.shape == (Hp, D), "weights not packed for this x"

    xm = x.reshape(-1, D)
    M = xm.shape[0]

    x_itemsize = jnp.dtype(x.dtype).itemsize
    w_itemsize = jnp.dtype(w13.dtype).itemsize
    sublane = {4: 8, 2: 16, 1: 32}.get(x_itemsize, 8)

    # ---- generation-aware token tile ---------------------------------------
    cap = _vmem_capacity_bytes()
    budget = int(0.80 * cap)
    tm_target = 1024 if cap >= 96 * 2**20 else 768     # 128 MiB vs 64 MiB parts
    if tm is None:
        if M <= tm_target:
            tm = _round_up(max(M, 1), sublane)
        else:  # balance tiles over M to avoid a mostly-padded last tile
            tm = _round_up(_cdiv(M, _cdiv(M, tm_target)), sublane)
    else:
        tm = _round_up(tm, sublane)

    # Conservative VMEM model: every block double-buffered, f32 acc + interms.
    def _vmem_use(tm_):
        return (2 * tm_ * D * x_itemsize               # x tile
                + 2 * tm_ * D * x_itemsize             # out tile
                + 2 * D * 2 * th * w_itemsize          # packed [W1|W3] block
                + 2 * th * D * w_itemsize              # W2 block
                + tm_ * D * 4                          # f32 accumulator
                + 3 * tm_ * 2 * th * 4)                # f32 intermediates

    while _vmem_use(tm) > budget and tm > sublane:
        new_tm = tm - 128 if tm > 256 else tm // 2
        tm = _round_up(max(sublane, new_tm), sublane)

    Mp = _round_up(M, tm)
    if Mp != M:
        xm = jnp.pad(xm, ((0, Mp - M), (0, 0)))        # token padding is inert

    grid = (Mp // tm, nh)

    est_vmem = _vmem_use(tm)
    vmem_limit = int(min(0.85 * cap, max(32 * 2**20, 1.4 * est_vmem)))

    cost = pl.CostEstimate(
        flops=int(6 * Mp * D * Hp),
        transcendentals=int(2 * Mp * Hp),              # exp + reciprocal
        bytes_accessed=int(2 * Mp * D * x_itemsize
                           + (Mp // tm) * 3 * D * Hp * w_itemsize),
    )

    out = pl.pallas_call(
        functools.partial(_swiglu_kernel, th=th),
        out_shape=jax.ShapeDtypeStruct((Mp, D), x.dtype),
        grid_spec=pltpu.PrefetchScalarGridSpec(
            num_scalar_prefetch=0,
            grid=grid,
            in_specs=[
                pl.BlockSpec((tm, D), lambda i, j: (i, 0)),            # x tile
                pl.BlockSpec((1, D, 2 * th), lambda i, j: (j, 0, 0)),  # [W1|W3]
                pl.BlockSpec((th, D), lambda i, j: (j, 0)),            # W2 tile
            ],
            out_specs=pl.BlockSpec((tm, D), lambda i, j: (i, 0)),
            scratch_shapes=[pltpu.VMEM((tm, D), jnp.float32)],
        ),
        compiler_params=pltpu.CompilerParams(
            dimension_semantics=("parallel", "arbitrary"),
            vmem_limit_bytes=vmem_limit),
        cost_estimate=cost,
    )(xm, w13, w2p)

    if Mp != M:
        out = out[:M]
    return out.reshape(orig_shape)


# ---------------------------------------------------------------------------
# Convenience wrapper (packs weights per call -- demos / single calls only)
# ---------------------------------------------------------------------------
def swiglu(x, w1, w3, w2, *, tm=None, th=None):
    """x: (..., dim); w1, w3: (dim, hidden); w2: (hidden, dim).

    NOTE: repacks/pads the weights on every call. For repeated forwards, call
    `pack_swiglu_weights` once and use `swiglu_packed`.
    """
    w13, w2p = pack_swiglu_weights(w1, w3, w2, th=th)
    return swiglu_packed(x, w13, w2p, tm=tm)


def _reference(x, w1, w3, w2):
    h1 = x @ w1
    h3 = x @ w3
    return (h1 * jax.nn.sigmoid(h1) * h3) @ w2


if __name__ == "__main__":
    # ---- 1. Module-default shapes: SwiGLU(dim=32) -> hidden = 88 -----------
    batch, seq, dim = 2, 8, 32
    hidden_dim = 4 * dim
    hidden_dim = int(2 * hidden_dim / 3)
    multiple_of = 4
    hidden_dim = multiple_of * ((hidden_dim + multiple_of - 1) // multiple_of)  # 88

    key = jax.random.PRNGKey(0)
    kx, k1, k2, k3 = jax.random.split(key, 4)
    x = jax.random.normal(kx, (batch, seq, dim), dtype=jnp.float32)
    # nn.Linear default init: U(-1/sqrt(fan_in), 1/sqrt(fan_in)); stored (in, out).
    w1 = jax.random.uniform(k1, (dim, hidden_dim), jnp.float32,
                            minval=-1.0, maxval=1.0) / jnp.sqrt(dim)
    w3 = jax.random.uniform(k3, (dim, hidden_dim), jnp.float32,
                            minval=-1.0, maxval=1.0) / jnp.sqrt(dim)
    w2 = jax.random.uniform(k2, (hidden_dim, dim), jnp.float32,
                            minval=-1.0, maxval=1.0) / jnp.sqrt(hidden_dim)

    y = swiglu(x, w1, w3, w2)
    jax.block_until_ready(y)
    y_ref = _reference(x, w1, w3, w2)
    assert y.shape == (batch, seq, dim)
    assert jnp.allclose(y, y_ref, atol=2e-3, rtol=2e-3), "mismatch (module defaults)"

    # ---- 2. Tiled path with pre-packed weights: token pad 40->48, nh=4 -----
    b2, s2, d2, h2 = 2, 20, 128, 512
    kx2, k12, k22, k32 = jax.random.split(jax.random.PRNGKey(1), 4)
    x2 = jax.random.normal(kx2, (b2, s2, d2), dtype=jnp.float32)
    w1b = jax.random.uniform(k12, (d2, h2), jnp.float32,
                             minval=-1.0, maxval=1.0) / jnp.sqrt(d2)
    w3b = jax.random.uniform(k32, (d2, h2), jnp.float32,
                             minval=-1.0, maxval=1.0) / jnp.sqrt(d2)
    w2b = jax.random.uniform(k22, (h2, d2), jnp.float32,
                             minval=-1.0, maxval=1.0) / jnp.sqrt(h2)
    w13b, w2bp = pack_swiglu_weights(w1b, w3b, w2b, th=128)     # pack ONCE
    y2 = swiglu_packed(x2, w13b, w2bp, tm=16)
    jax.block_until_ready(y2)
    y2_ref = _reference(x2, w1b, w3b, w2b)
    assert jnp.allclose(y2, y2_ref, atol=2e-3, rtol=2e-3), "mismatch (tiled/packed)"

    # ---- 3. Extreme inputs: exp(-h1) overflow must drive the gate to 0 -----
    d3, hd3 = 64, 256
    kx3, k13, k23, k33 = jax.random.split(jax.random.PRNGKey(2), 4)
    x3 = 60.0 * jax.random.normal(kx3, (2, 8, d3), dtype=jnp.float32)
    w1c = jax.random.uniform(k13, (d3, hd3), jnp.float32,
                             minval=-1.0, maxval=1.0) / jnp.sqrt(d3)
    w3c = jax.random.uniform(k33, (d3, hd3), jnp.float32,
                             minval=-1.0, maxval=1.0) / jnp.sqrt(d3)
    w2c = jax.random.uniform(k23, (hd3, d3), jnp.float32,
                             minval=-1.0, maxval=1.0) / jnp.sqrt(hd3)
    y3 = swiglu(x3, w1c, w3c, w2c)
    jax.block_until_ready(y3)
    y3_ref = _reference(x3, w1c, w3c, w2c)
    assert bool(jnp.all(jnp.isfinite(y3))), "non-finite output on extreme inputs"
    rel = jnp.max(jnp.abs(y3 - y3_ref)) / (jnp.max(jnp.abs(y3_ref)) + 1e-6)
    assert float(rel) < 1e-2, f"mismatch (extreme inputs), rel={float(rel)}"

    print("KERNEL_OK")
</pallas_src>

<mosaic_0001>
module attributes {stable_mosaic.version = 11 : i64} {
  func.func @_swiglu_kernel(%arg0: i32, %arg1: i32, %arg2: memref<16x32xf32, #tpu.memory_space<vmem>>, %arg3: memref<1x32x176xf32, #tpu.memory_space<vmem>>, %arg4: memref<88x32xf32, #tpu.memory_space<vmem>>, %arg5: memref<16x32xf32, #tpu.memory_space<vmem>>, %arg6: memref<16x32xf32, #tpu.memory_space<vmem>>) attributes {dimension_semantics = [#tpu.dimension_semantics<parallel>, #tpu.dimension_semantics<arbitrary>], iteration_bounds = array<i64: 1, 1>, scalar_prefetch = 0 : i64, scratch_operands = 1 : i64, tpu.core_type = #tpu.core_type<tc>, window_params = [{transform_indices = @transform_0, window_bounds = array<i64: 16, 32>}, {transform_indices = @transform_1, window_bounds = array<i64: 1, 32, 176>}, {transform_indices = @transform_2, window_bounds = array<i64: 88, 32>}, {transform_indices = @transform_3, window_bounds = array<i64: 16, 32>}]} {
    %c0_i32 = arith.constant 0 : i32
    %0 = arith.cmpi eq, %arg1, %c0_i32 : i32
    %1 = arith.extui %0 : i1 to i32
    %c0_i32_0 = arith.constant 0 : i32
    %2 = arith.cmpi ne, %1, %c0_i32_0 : i32
    scf.if %2 {
      %cst_16 = arith.constant 0.000000e+00 : f32
      %25 = vector.broadcast %cst_16 : f32 to vector<16x32xf32>
      %c0_17 = arith.constant 0 : index
      %c0_18 = arith.constant 0 : index
      %26 = vector.load %arg6[%c0_17, %c0_18] : memref<16x32xf32, #tpu.memory_space<vmem>>, vector<16x32xf32>
      tpu.vector_store %arg6[%c0_17, %c0_18], %25 {strides = array<i32>} : memref<16x32xf32, #tpu.memory_space<vmem>>, vector<16x32xf32>,
    } else {
    }
    %c0 = arith.constant 0 : index
    %c0_1 = arith.constant 0 : index
    %3 = vector.load %arg2[%c0, %c0_1] : memref<16x32xf32, #tpu.memory_space<vmem>>, vector<16x32xf32>
    %c0_2 = arith.constant 0 : index
    %c0_3 = arith.constant 0 : index
    %c0_4 = arith.constant 0 : index
    %4 = vector.load %arg3[%c0_2, %c0_3, %c0_4] : memref<1x32x176xf32, #tpu.memory_space<vmem>>, vector<1x32x176xf32>
    %5 = vector.shape_cast %4 : vector<1x32x176xf32> to vector<32x176xf32>
    %cst = arith.constant dense<0.000000e+00> : vector<16x176xf32>
    %6 = tpu.matmul %3, %5, %cst {dimension_numbers = #tpu.dot_dimension_numbers<[1], [0], [0], [1], [0, 0, 1, 1], [], []>} : vector<16x32xf32>, vector<32x176xf32>, vector<16x176xf32> -> vector<16x176xf32>
    %7 = vector.extract_strided_slice %6 {offsets = [0, 0], sizes = [16, 88], strides = [1, 1]} : vector<16x176xf32> to vector<16x88xf32>
    %8 = vector.extract_strided_slice %6 {offsets = [0, 88], sizes = [16, 88], strides = [1, 1]} : vector<16x176xf32> to vector<16x88xf32>
    %cst_5 = arith.constant 0.000000e+00 : f32
    %9 = vector.broadcast %cst_5 : f32 to vector<16x88xf32>
    %10 = arith.subf %9, %7 : vector<16x88xf32>
    %11 = math.exp %10 : vector<16x88xf32>
    %cst_6 = arith.constant 1.000000e+00 : f32
    %12 = vector.broadcast %cst_6 : f32 to vector<16x88xf32>
    %13 = arith.addf %12, %11 : vector<16x88xf32>
    %14 = tpu.reciprocal %13 {approx = true} : vector<16x88xf32> -> vector<16x88xf32>
    %15 = arith.mulf %7, %14 : vector<16x88xf32>
    %16 = arith.mulf %15, %8 : vector<16x88xf32>
    %c0_7 = arith.constant 0 : index
    %c0_8 = arith.constant 0 : index
    %17 = vector.load %arg6[%c0_7, %c0_8] : memref<16x32xf32, #tpu.memory_space<vmem>>, vector<16x32xf32>
    %c0_9 = arith.constant 0 : index
    %c0_10 = arith.constant 0 : index
    %18 = vector.load %arg4[%c0_9, %c0_10] : memref<88x32xf32, #tpu.memory_space<vmem>>, vector<88x32xf32>
    %cst_11 = arith.constant dense<0.000000e+00> : vector<16x32xf32>
    %19 = tpu.matmul %16, %18, %cst_11 {dimension_numbers = #tpu.dot_dimension_numbers<[1], [0], [0], [1], [0, 0, 1, 1], [], []>} : vector<16x88xf32>, vector<88x32xf32>, vector<16x32xf32> -> vector<16x32xf32>
    %20 = arith.addf %17, %19 : vector<16x32xf32>
    %c0_12 = arith.constant 0 : index
    %c0_13 = arith.constant 0 : index
    %21 = vector.load %arg6[%c0_12, %c0_13] : memref<16x32xf32, #tpu.memory_space<vmem>>, vector<16x32xf32>
    tpu.vector_store %arg6[%c0_12, %c0_13], %20 {strides = array<i32>} : memref<16x32xf32, #tpu.memory_space<vmem>>, vector<16x32xf32>,
    %c0_i32_14 = arith.constant 0 : i32
    %22 = arith.cmpi eq, %arg1, %c0_i32_14 : i32
    %23 = arith.extui %22 : i1 to i32
    %c0_i32_15 = arith.constant 0 : i32
    %24 = arith.cmpi ne, %23, %c0_i32_15 : i32
    scf.if %24 {
      %c0_16 = arith.constant 0 : index
      %c0_17 = arith.constant 0 : index
      %25 = vector.load %arg6[%c0_16, %c0_17] : memref<16x32xf32, #tpu.memory_space<vmem>>, vector<16x32xf32>
      %c0_18 = arith.constant 0 : index
      %c0_19 = arith.constant 0 : index
      %26 = vector.load %arg5[%c0_18, %c0_19] : memref<16x32xf32, #tpu.memory_space<vmem>>, vector<16x32xf32>
      tpu.vector_store %arg5[%c0_18, %c0_19], %25 {strides = array<i32>} : memref<16x32xf32, #tpu.memory_space<vmem>>, vector<16x32xf32>,
    } else {
    }
    return
  }
  func.func @transform_0(%arg0: i32, %arg1: i32) -> (i32, i32) {
    %c0_i32 = arith.constant 0 : i32
    %c0_i32_0 = arith.constant 0 : i32
    return %arg0, %c0_i32 : i32, i32
  }
  func.func @transform_1(%arg0: i32, %arg1: i32) -> (i32, i32, i32) {
    %c0_i32 = arith.constant 0 : i32
    %c0_i32_0 = arith.constant 0 : i32
    %c0_i32_1 = arith.constant 0 : i32
    return %arg1, %c0_i32, %c0_i32_0 : i32, i32, i32
  }
  func.func @transform_2(%arg0: i32, %arg1: i32) -> (i32, i32) {
    %c0_i32 = arith.constant 0 : i32
    %c0_i32_0 = arith.constant 0 : i32
    return %arg1, %c0_i32 : i32, i32
  }
  func.func @transform_3(%arg0: i32, %arg1: i32) -> (i32, i32) {
    %c0_i32 = arith.constant 0 : i32
    %c0_i32_0 = arith.constant 0 : i32
    return %arg0, %c0_i32 : i32, i32
  }
}

</mosaic_0001>

<bundles_post_ra>
// kernel: swiglu_packed.1
= control target key start
LH: loop header
LB: loop body
LE: loop exit
PB: predicated region body
PF: predicated region fallthrough
CT: control target
= control target key end

     0   :  { %vm19_vm0 = vcmask 261120   ;;  %v346_v4 = vmov 0.0   ;;  %s445_s0 = inlined_call_operand.vmem [shape: f32[16,32], index: 0, kind: input, shape index: {}]   ;;  %s446_s1 = inlined_call_operand.vmem [shape: f32[1,32,176], index: 1, kind: input, shape index: {}]   ;;  %s447_s2 = inlined_call_operand.vmem [shape: f32[88,32], index: 2, kind: input, shape index: {}]   ;;  %s448_s3 = inlined_call_operand.hbm [shape: f32[16,32], index: 3, kind: output, shape index: {}]  }
   0x1   :  { %v31_v0 = vld [vmem:[%s446_s1 + $0x38] sm:$0xff]  ;;  %v30_v1 = vld [vmem:[%s446_s1 + $0x30] sm:$0xff]  ;;  %v29_v2 = vld [vmem:[%s446_s1 + $0x28] sm:$0xff]  ;;  %20 = vst.msk [vmem:[#allocation2] sm:$0xff] %vm19_vm0, %v346_v4  ;;  %103 = vmatprep.mubr.f32.mxu0 %v346_v4 }
   0x2   :  { %63 = vmatprep.subr.mxu0 %v31_v0  ;;  %v28_v3 = vld [vmem:[%s446_s1 + $0x20] sm:$0xff]  ;;  %21 = vst.msk [vmem:[#allocation2 + $0x8] sm:$0xff] %vm19_vm0, %v346_v4  ;;  %v27_v5 = vld [vmem:[%s446_s1 + $0x18] sm:$0xff]  ;;  %v26_v6 = vld [vmem:[%s446_s1 + $0x10] sm:$0xff] }
   0x3   :  { %64 = vmatpush1.msra.mxu0 %v30_v1 }
   0x4   :  { %65 = vmatprep.subr.mxu0 %v29_v2 }
   0x5   :  { %8 = vsyncpa [#allocation4], 0  ;;  %66 = vmatpush1.msra.mxu0 %v28_v3  ;;  %v25_v7 = vld [vmem:[%s446_s1 + $0x8] sm:$0xff]  ;;  %v24_v8 = vld [vmem:[%s446_s1] sm:$0xff]  ;;  %s347_s25 = smov 40   ;;  %vm140_vm1 = vcmask 326656  }
   0x6   :  { %67 = vmatprep.subr.mxu0 %v27_v5  ;;  %v22_v9 = vld [vmem:[%s445_s0] sm:$0xff]  ;;  %v23_v10 = vld [vmem:[%s445_s0 + $0x8] sm:$0xff]  ;;  %v159_v11 = vld [vmem:[%s447_s2 + $0x50] sm:$0xff]  ;;  %vm160_vm2 = vcmask 719872  }
   0x7   :  { %68 = vmatpush1.msra.mxu0 %v26_v6  ;;  %v158_v12 = vld [vmem:[%s447_s2 + $0x48] sm:$0xff]  ;;  %286 = vmatprep.subr.mxu1 %v159_v11  ;;  %v157_v13 = vld [vmem:[%s447_s2 + $0x40] sm:$0xff]  ;;  %v156_v14 = vld [vmem:[%s447_s2 + $0x38] sm:$0xff] }
   0x8   :  { %69 = vmatprep.subr.mxu0 %v25_v7  ;;  %287 = vmatpush3.msra.mxu1 %v159_v11  ;;  %v155_v15 = vld [vmem:[%s447_s2 + $0x30] sm:$0xff]  ;;  %v154_v16 = vld [vmem:[%s447_s2 + $0x28] sm:$0xff]  ;;  %v153_v17 = vld [vmem:[%s447_s2 + $0x20] sm:$0xff] }
   0x9   :  { %70 = vmatpush1.msra.mxu0 %v24_v8  ;;  %288 = vmatprep.subr.mxu1 %v158_v12  ;;  %v152_v18 = vld [vmem:[%s447_s2 + $0x18] sm:$0xff]  ;;  %v151_v19 = vld [vmem:[%s447_s2 + $0x10] sm:$0xff]  ;;  %v150_v20 = vld [vmem:[%s447_s2 + $0x8] sm:$0xff] }
   0xa   :  { %269 = vmatmul.mubr.msk.f32.vlgmr.msra.gmra.mxu0 %vm19_vm0, %v22_v9  ;;  %289 = vmatpush3.msra.mxu1 %v158_v12  ;;  %v149_v21 = vld [vmem:[%s447_s2] sm:$0xff]  ;;  %v148_v46 = vld [vmem:[#allocation2 + $0x8] sm:$0xff]  ;;  %s348_s2 = smov [#allocation3]  }
   0xb   :  { %109 = vmatprep.mubr.f32.mxu0 %v346_v4  ;;  %290 = vmatprep.subr.mxu1 %v157_v13  ;;  %v147_v48 = vld [vmem:[#allocation2] sm:$0xff]  ;;  %s258_s26 = sshll.u32 %s348_s2, 4  ;;  %s259_s26 = int_to_ptr.vmem [resolvable:$true] %s258_s26 }
   0xc   :  { %291 = vmatpush3.msra.mxu1 %v157_v13  ;;  %s324_s27 = scalar_lea.vmem %s259_s26, 256  ;;  %p329_p1 = scmp.lt.s32.totalorder %s259_s26, %s259_s26 }
   0xd   :  { %292 = vmatprep.subr.mxu1 %v156_v14  ;;  %p325_p0 = scmp.ne.s32.totalorder %s259_s26, %s324_s27  ;;  %p330_p2 = scmp.lt.s32.totalorder %s324_s27, %s324_s27 }
   0xe   :  { %270 = vmatmul.mubr.msk.f32.gmra.mxu0 %vm19_vm0, %v23_v10  ;;  %293 = vmatpush3.msra.mxu1 %v156_v14 }
   0xf   :  { %294 = vmatprep.subr.mxu1 %v155_v15  ;;  %p331_p3 = por %p330_p2, %p329_p1 }
  0x10   :  { %295 = vmatpush3.msra.mxu1 %v155_v15 }
  0x11   :  { %296 = vmatprep.subr.mxu1 %v154_v16  ;;  %p332_p4 = pnand %p331_p3, %p325_p0 }
  0x12   :  { %297 = vmatpush3.msra.mxu1 %v154_v16 }
  0x13   :  { %298 = vmatprep.subr.mxu1 %v153_v17 }
  0x14   :  { %299 = vmatpush3.msra.mxu1 %v153_v17 }
  0x15   :  { %300 = vmatprep.subr.mxu1 %v152_v18 }
  0x16   :  { %301 = vmatpush3.msra.mxu1 %v152_v18 }
  0x17   :  { %302 = vmatprep.subr.mxu1 %v151_v19 }
  0x18   :  { %303 = vmatpush3.msra.mxu1 %v151_v19 }
  0x19   :  { %304 = vmatprep.subr.mxu1 %v150_v20 }
  0x1a   :  { %305 = vmatpush3.msra.mxu1 %v150_v20 }
  0x1b   :  { %306 = vmatprep.subr.mxu1 %v149_v21 }
  0x1c   :  { %307 = vmatpush3.msra.mxu1 %v149_v21 }
  0xca   :  { %v105_v22 = vpop.f32.mrf.mxu0 }
  0xcb   :  { %132 = vrot.lane.b32.xlu0 %v105_v22, %s347_s25  ;;  %v116_v26 = vsub.f32 0.0, %v105_v22 }
  0xcc   :  { %v107_v23 = vpop.f32.mrf.mxu0 }
  0xcd   :  { %v118_v27 = vmul.f32 1.442695, %v116_v26 }
  0xce   :  { %v111_v24 = vpop.f32.mrf.mxu0 }
  0xcf   :  { %134 = vrot.lane.b32.xlu0 %v107_v23, %s347_s25  ;;  %136 = vrot.lane.b32.xlu1 %v111_v24, %s347_s25  ;;  %v117_v28 = vsub.f32 0.0, %v111_v24  ;;  %316 = vpow2.f32 %v118_v27 }
  0xd0   :  { %v113_v25 = vpop.f32.mrf.mxu0 }
  0xd1   :  { %v120_v29 = vmul.f32 1.442695, %v117_v28 }
  0xd3   :  { %138 = vrot.lane.b32.xlu1 %v113_v25, %s347_s25  ;;  %318 = vpow2.f32 %v120_v29 }
  0xdc   :  { %v317_v30 = vpop.eup %316 }
  0xdd   :  { %v122_v31 = vadd.f32 1.0, %v317_v30 }
  0xdf   :  { %320 = vrcp.f32 %v122_v31 }
  0xe0   :  { %v319_v32 = vpop.eup %318 }
  0xe1   :  { %v123_v33 = vadd.f32 1.0, %v319_v32 }
  0xe3   :  { %322 = vrcp.f32 %v123_v33 }
  0xec   :  { %v321_v35 = vpop.eup %320 }
  0xed   :  { %v126_v38 = vmul.f32 %v321_v35, %v105_v22 }
  0xf0   :  { %v323_v39 = vpop.eup %322 }
  0xf1   :  { %v127_v42 = vmul.f32 %v323_v39, %v111_v24 }
 0x13d   :  { %v133_v34 = vpop.permute.xlu0 %132 }
 0x141   :  { %v135_v36 = vpop.permute.xlu0 %134  ;;  %v137_v37 = vpop.permute.xlu1 %136 }
 0x142   :  { %v141_v40 = vsel %vm140_vm1, %v133_v34, %v135_v36 }
 0x143   :  { %v145_v41 = vmul.f32 %v141_v40, %v126_v38 }
 0x145   :  { %308 = vmatprep.mubr.msk.f32.mxu1 %vm160_vm2, %v145_v41  ;;  %v139_v43 = vpop.permute.xlu1 %138 }
 0x146   :  { %v142_v44 = vsel %vm140_vm1, %v137_v37, %v139_v43 }
 0x147   :  { %v146_v45 = vmul.f32 %v142_v44, %v127_v42 }
 0x149   :  { %309 = vmatmul.mubr.msk.f32.vlgmr.msra.gmra.mxu1 %vm160_vm2, %v146_v45 }
 0x209   :  { %v310_v47 = vpop.f32.mrf.mxu1 }
 0x20a   :  { %v243_v49 = vadd.f32 %v310_v47, %v148_v46 }
 0x20b   :  { %v233_v50 = vpop.f32.mrf.mxu1 }
 0x20c   :  { %245 = vst.msk [vmem:[#allocation2 + $0x8] sm:$0xff] %vm19_vm0, %v243_v49  ;;  %v242_v51 = vadd.f32 %v233_v50, %v147_v48 }
 0x20e   :  { %244 = vst.msk [vmem:[#allocation2] sm:$0xff] %vm19_vm0, %v242_v51 }
 0x213   :  { %v250_v52 = vld [vmem:[#allocation2 + $0x8] sm:$0xff] }
 0x214   :  { %252 = vst.msk [vmem:[#allocation3 + $0x8] sm:$0xff] %vm19_vm0, %v250_v52 }
 0x215   :  { %v249_v53 = vld [vmem:[#allocation2] sm:$0xff] }
 0x216   :  { %251 = vst.msk [vmem:[#allocation3] sm:$0xff] %vm19_vm0, %v249_v53 }
 0x217   :  { %335 = shalt.err (!%p332_p4)
}
 0x218   :  { %s349_s28 = smov 128   ;;  %s350_s29 = smov 8  }
 0x219   :  { %264 = dma.vmem_to_hbm [thread:$0]  %s259_s26, 256, %s448_s3, [#allocation4], %s349_s28, %s349_s28, %s350_s29  }
 0x21a   :  { %344 = dma.done.wait [#allocation4], 256  }
 0x21b   :  { %345 = vsyncadd [#allocation4], 4294967040 }
 0x21c   :  { %268 = vsyncpa [#allocation4], 1 }

</bundles_post_ra>
